<compile_context>
chip_gen: v5e
topology: v5e:2x2
jax: 0.10.0
libtpu: 0.0.40
codegen_flags: <defaults>
</compile_context>

<pallas_src>
import functools

import jax
import jax.numpy as jnp
from jax.experimental import pallas as pl
from jax.experimental.pallas import tpu as pltpu


# ------------------------------- kernels -----------------------------------


def _se_fused_kernel(x_ref, w1t_ref, w2t_ref, o_ref):
    """Single-pass SE block over a (Bb, C, HW) batch-block."""
    x = x_ref[...]                                            # (Bb, C, HW)
    # squeeze: streaming f32 accumulation (no full-block f32 temp).
    # 1/HW is already folded into w1t, so the plain sum gives the exact mean
    # path after the first matmul.
    pooled = jnp.sum(x, axis=2, dtype=jnp.float32)            # (Bb, C)
    # excitation: Linear -> ReLU -> Linear -> Sigmoid (weights pre-transposed)
    h = jnp.dot(pooled, w1t_ref[...], preferred_element_type=jnp.float32)
    h = jnp.maximum(h, 0.0)                                   # (Bb, Cr)
    s = jnp.dot(h, w2t_ref[...], preferred_element_type=jnp.float32)
    scale = jax.nn.sigmoid(s)                                 # (Bb, C) f32
    # rescale in the native dtype (bf16 stays bf16 on v6e/v7x).
    o_ref[...] = (x * scale[:, :, None].astype(x.dtype)).astype(o_ref.dtype)


def _pool_scale_kernel(x_ref, w1t_ref, w2t_ref, scale_ref, *, hw, hw_tile):
    """Fallback pass 1: pooled f32 sum over spatial tiles, excitation at end.

    Grid: (batch blocks, spatial tiles); the spatial axis is a reduction with
    the (Bb, 1, C) scale block resident across it.
    """
    s = pl.program_id(1)

    @pl.when(s == 0)
    def _():
        scale_ref[...] = jnp.zeros_like(scale_ref)

    x = x_ref[...]                                            # (Bb, C, HWt)
    # Mask the ragged spatial tail: out-of-bounds lanes of the last tile hold
    # unspecified data and must contribute zero to the pooled sum.
    lane = jax.lax.broadcasted_iota(jnp.int32, x.shape, 2)
    valid = (s * hw_tile + lane) < hw
    xz = jnp.where(valid, x, jnp.zeros_like(x))
    scale_ref[...] += jnp.sum(xz, axis=2, dtype=jnp.float32)[:, None, :]

    @pl.when(s == pl.num_programs(1) - 1)
    def _():
        pooled = scale_ref[:, 0, :]                           # (Bb, C) f32
        h = jnp.dot(pooled, w1t_ref[...], preferred_element_type=jnp.float32)
        h = jnp.maximum(h, 0.0)
        sc = jax.nn.sigmoid(
            jnp.dot(h, w2t_ref[...], preferred_element_type=jnp.float32))
        scale_ref[...] = sc[:, None, :]


def _rescale_kernel(x_ref, scale_ref, o_ref):
    """Fallback pass 2: apply the per-(b, c) scale to one spatial tile."""
    x = x_ref[...]                                            # (Bb, C, HWt)
    sc = scale_ref[:, 0, :].astype(x.dtype)                   # (Bb, C)
    o_ref[...] = (x * sc[:, :, None]).astype(o_ref.dtype)


# ---------------------------- block-size policy ----------------------------


def _round_down(x, m):
    return (x // m) * m


def _vmem_policy():
    """Return (vmem_limit_bytes, per-block budget) from physical VMEM size."""
    phys = None
    try:
        phys = pltpu.get_tpu_info().vmem_capacity_bytes
    except Exception:  # not on TPU / API shape differs -> conservative default
        phys = None
    if phys is not None and phys <= (64 << 20):
        # v7x-class: 64 MiB physical VMEM per TensorCore.
        return 56 << 20, 8 << 20
    if phys is not None and phys >= (128 << 20):
        # v5e / v6e: 128 MiB physical VMEM (default scoped limit is far less,
        # so raise it explicitly).
        return 104 << 20, 16 << 20
    return 64 << 20, 8 << 20


def _num_tensorcores():
    """Best-effort TensorCore-per-chip count (v7x has 2, v5e/v6e have 1)."""
    try:
        kind = (getattr(jax.devices()[0], "device_kind", "") or "").lower()
        if "v7" in kind or "7x" in kind:
            return 2
    except Exception:
        pass
    return 1


# ------------------------------- wrapper ------------------------------------


def se_block(x, w1, w2, *, block_budget_bytes=None, vmem_limit_bytes=None):
    """SE block forward.

    x : (B, C, H, W)   input feature map (NCHW, like PyTorch)
    w1: (C//r, C)      first  nn.Linear weight (out_features, in_features)
    w2: (C, C//r)      second nn.Linear weight (out_features, in_features)
    """
    B, C, H, W = x.shape
    Cr = w1.shape[0]
    HW = H * W

    vmem_default, budget_default = _vmem_policy()
    if vmem_limit_bytes is None:
        vmem_limit_bytes = vmem_default
    if block_budget_bytes is None:
        block_budget_bytes = budget_default

    # Contiguous NCHW -> (B, C, HW) is a free (bitcast) reshape: no padding,
    # no slicing, no extra HBM passes regardless of HW % 128.
    x_flat = x.reshape(B, C, HW)

    # Pre-transpose weights for lane-dense row math and fold 1/HW into the
    # first Linear (exact: the layer is linear and precedes the ReLU).
    inv_hw = 1.0 / float(HW)
    w1t = (w1 * inv_hw).T                                     # (C, Cr)
    w2t = w2.T                                                # (Cr, C)

    itemsize = jnp.dtype(x.dtype).itemsize
    per_elem_bytes = C * HW * itemsize
    num_cores = _num_tensorcores()

    if per_elem_bytes <= block_budget_bytes:
        # ---------------- fused single-pass path --------------------------
        bb = max(1, min(B, block_budget_bytes // per_elem_bytes))
        if num_cores > 1:
            # Give every TensorCore >= 2 blocks when the batch allows it so
            # each core can double-buffer; on 1-TC parts keep blocks maximal.
            target_steps = min(B, 2 * num_cores)
            bb = min(bb, pl.cdiv(B, target_steps))
        n_blocks = pl.cdiv(B, bb)   # ragged tail block handled by Pallas

        out_flat = pl.pallas_call(
            _se_fused_kernel,
            out_shape=jax.ShapeDtypeStruct((B, C, HW), x.dtype),
            grid_spec=pltpu.PrefetchScalarGridSpec(
                num_scalar_prefetch=0,
                grid=(n_blocks,),
                in_specs=[
                    pl.BlockSpec((bb, C, HW), lambda b: (b, 0, 0)),
                    # constant block index -> weights resident in VMEM
                    pl.BlockSpec((C, Cr), lambda b: (0, 0)),
                    pl.BlockSpec((Cr, C), lambda b: (0, 0)),
                ],
                out_specs=pl.BlockSpec((bb, C, HW), lambda b: (b, 0, 0)),
            ),
            compiler_params=pltpu.CompilerParams(
                dimension_semantics=("parallel",),
                vmem_limit_bytes=vmem_limit_bytes),
        )(x_flat, w1t, w2t)
        return out_flat.reshape(B, C, H, W)

    # -------- spatial-tiled two-pass fallback (huge feature maps) ----------
    # Pass 1 streams (1, C, hw_tile) tiles to build the pooled sums and
    # computes the per-(b, c) sigmoid scale; pass 2 re-reads x tile-by-tile
    # and rescales (costs one extra HBM read of x, but stays within VMEM).
    bb = 1
    hw_tile = max(128, _round_down(block_budget_bytes // (C * itemsize), 128))
    if hw_tile >= HW:
        hw_tile = HW
    n_hw = pl.cdiv(HW, hw_tile)
    n_b = pl.cdiv(B, bb)

    scale = pl.pallas_call(
        functools.partial(_pool_scale_kernel, hw=HW, hw_tile=hw_tile),
        out_shape=jax.ShapeDtypeStruct((B, 1, C), jnp.float32),
        grid_spec=pltpu.PrefetchScalarGridSpec(
            num_scalar_prefetch=0,
            grid=(n_b, n_hw),
            in_specs=[
                pl.BlockSpec((bb, C, hw_tile), lambda b, s: (b, 0, s)),
                pl.BlockSpec((C, Cr), lambda b, s: (0, 0)),
                pl.BlockSpec((Cr, C), lambda b, s: (0, 0)),
            ],
            out_specs=pl.BlockSpec((bb, 1, C), lambda b, s: (b, 0, 0)),
        ),
        compiler_params=pltpu.CompilerParams(
            dimension_semantics=("parallel", "arbitrary"),
            vmem_limit_bytes=vmem_limit_bytes),
    )(x_flat, w1t, w2t)

    out_flat = pl.pallas_call(
        _rescale_kernel,
        out_shape=jax.ShapeDtypeStruct((B, C, HW), x.dtype),
        grid_spec=pltpu.PrefetchScalarGridSpec(
            num_scalar_prefetch=0,
            grid=(n_b, n_hw),
            in_specs=[
                pl.BlockSpec((bb, C, hw_tile), lambda b, s: (b, 0, s)),
                pl.BlockSpec((bb, 1, C), lambda b, s: (b, 0, 0)),
            ],
            out_specs=pl.BlockSpec((bb, C, hw_tile), lambda b, s: (b, 0, s)),
        ),
        compiler_params=pltpu.CompilerParams(
            dimension_semantics=("parallel", "parallel"),
            vmem_limit_bytes=vmem_limit_bytes),
    )(x_flat, scale)
    return out_flat.reshape(B, C, H, W)


# ------------------------------ reference ----------------------------------


def se_block_reference(x, w1, w2):
    y = jnp.mean(x, axis=(2, 3))                    # (B, C)
    y = jnp.maximum(y @ w1.T, 0.0)                  # (B, Cr)
    y = jax.nn.sigmoid(y @ w2.T)                    # (B, C)
    return x * y[:, :, None, None]


if __name__ == "__main__":
    key = jax.random.PRNGKey(0)
    reduction = 16

    def make_case(k, B, C, H, W):
        Cr = max(1, C // reduction)
        kx, k1, k2 = jax.random.split(k, 3)
        x = jax.random.normal(kx, (B, C, H, W), dtype=jnp.float32)
        # PyTorch nn.Linear layout: (out_features, in_features), no bias.
        w1 = 0.1 * jax.random.normal(k1, (Cr, C), dtype=jnp.float32)
        w2 = 0.1 * jax.random.normal(k2, (C, Cr), dtype=jnp.float32)
        return x, w1, w2

    # 1) fused single-pass path (HW multiple of 128).
    x, w1, w2 = make_case(jax.random.fold_in(key, 0), 2, 32, 16, 16)
    out = jax.block_until_ready(se_block(x, w1, w2))
    ref = se_block_reference(x, w1, w2)
    assert out.shape == x.shape
    assert jnp.allclose(out, ref, atol=1e-5, rtol=1e-5)

    # 2) fused path with HW not a multiple of 128 (no wrapper pad/slice) and
    #    a batch size that can produce a ragged tail batch-block.
    x, w1, w2 = make_case(jax.random.fold_in(key, 1), 3, 32, 15, 15)
    out = jax.block_until_ready(se_block(x, w1, w2))
    ref = se_block_reference(x, w1, w2)
    assert jnp.allclose(out, ref, atol=1e-5, rtol=1e-5)

    # 3) spatial-tiled two-pass fallback, forced via a tiny block budget
    #    (HW = 256 split into two 128-lane tiles).
    x, w1, w2 = make_case(jax.random.fold_in(key, 2), 2, 32, 16, 16)
    out = jax.block_until_ready(
        se_block(x, w1, w2, block_budget_bytes=16 * 1024))
    ref = se_block_reference(x, w1, w2)
    assert jnp.allclose(out, ref, atol=1e-5, rtol=1e-5)

    # 4) fallback with a ragged spatial tail (HW = 225, tile = 128).
    x, w1, w2 = make_case(jax.random.fold_in(key, 3), 2, 32, 15, 15)
    out = jax.block_until_ready(
        se_block(x, w1, w2, block_budget_bytes=16 * 1024))
    ref = se_block_reference(x, w1, w2)
    assert jnp.allclose(out, ref, atol=1e-5, rtol=1e-5)

    print("KERNEL_OK")
</pallas_src>

<mosaic_0001>
module attributes {stable_mosaic.version = 11 : i64} {
  func.func @_se_fused_kernel(%arg0: i32, %arg1: memref<2x32x256xf32, #tpu.memory_space<vmem>>, %arg2: memref<32x2xf32, #tpu.memory_space<vmem>>, %arg3: memref<2x32xf32, #tpu.memory_space<vmem>>, %arg4: memref<2x32x256xf32, #tpu.memory_space<vmem>>) attributes {dimension_semantics = [#tpu.dimension_semantics<parallel>], iteration_bounds = array<i64: 1>, scalar_prefetch = 0 : i64, scratch_operands = 0 : i64, tpu.core_type = #tpu.core_type<tc>, window_params = [{transform_indices = @transform_0, window_bounds = array<i64: 2, 32, 256>}, {pipeline_mode = #tpu.pipeline_mode<synchronous>, transform_indices = @transform_1, window_bounds = array<i64: 32, 2>}, {pipeline_mode = #tpu.pipeline_mode<synchronous>, transform_indices = @transform_2, window_bounds = array<i64: 2, 32>}, {transform_indices = @transform_3, window_bounds = array<i64: 2, 32, 256>}]} {
    %c0 = arith.constant 0 : index
    %c0_0 = arith.constant 0 : index
    %c0_1 = arith.constant 0 : index
    %0 = vector.load %arg1[%c0, %c0_0, %c0_1] : memref<2x32x256xf32, #tpu.memory_space<vmem>>, vector<2x32x256xf32>
    %cst = arith.constant dense<0.000000e+00> : vector<2x32xf32>
    %1 = vector.multi_reduction <add>, %0, %cst [2] : vector<2x32x256xf32> to vector<2x32xf32>
    %c0_2 = arith.constant 0 : index
    %c0_3 = arith.constant 0 : index
    %2 = vector.load %arg2[%c0_2, %c0_3] : memref<32x2xf32, #tpu.memory_space<vmem>>, vector<32x2xf32>
    %cst_4 = arith.constant dense<0.000000e+00> : vector<2x2xf32>
    %3 = tpu.matmul %1, %2, %cst_4 {dimension_numbers = #tpu.dot_dimension_numbers<[1], [0], [0], [1], [0, 0, 1, 1], [], []>} : vector<2x32xf32>, vector<32x2xf32>, vector<2x2xf32> -> vector<2x2xf32>
    %cst_5 = arith.constant 0.000000e+00 : f32
    %4 = vector.broadcast %cst_5 : f32 to vector<2x2xf32>
    %5 = arith.maximumf %3, %4 : vector<2x2xf32>
    %c0_6 = arith.constant 0 : index
    %c0_7 = arith.constant 0 : index
    %6 = vector.load %arg3[%c0_6, %c0_7] : memref<2x32xf32, #tpu.memory_space<vmem>>, vector<2x32xf32>
    %cst_8 = arith.constant dense<0.000000e+00> : vector<2x32xf32>
    %7 = tpu.matmul %5, %6, %cst_8 {dimension_numbers = #tpu.dot_dimension_numbers<[1], [0], [0], [1], [0, 0, 1, 1], [], []>} : vector<2x2xf32>, vector<2x32xf32>, vector<2x32xf32> -> vector<2x32xf32>
    %8 = arith.negf %7 : vector<2x32xf32>
    %9 = math.exp %8 : vector<2x32xf32>
    %cst_9 = arith.constant 1.000000e+00 : f32
    %10 = vector.broadcast %cst_9 : f32 to vector<2x32xf32>
    %11 = arith.addf %10, %9 : vector<2x32xf32>
    %12 = arith.divf %10, %11 : vector<2x32xf32>
    %13 = vector.shape_cast %12 : vector<2x32xf32> to vector<2x32x1xf32>
    %14 = vector.broadcast %13 : vector<2x32x1xf32> to vector<2x32x256xf32>
    %15 = arith.mulf %0, %14 : vector<2x32x256xf32>
    %c0_10 = arith.constant 0 : index
    %c0_11 = arith.constant 0 : index
    %c0_12 = arith.constant 0 : index
    %16 = vector.load %arg4[%c0_10, %c0_11, %c0_12] : memref<2x32x256xf32, #tpu.memory_space<vmem>>, vector<2x32x256xf32>
    tpu.vector_store %arg4[%c0_10, %c0_11, %c0_12], %15 {strides = array<i32>} : memref<2x32x256xf32, #tpu.memory_space<vmem>>, vector<2x32x256xf32>,
    return
  }
  func.func @transform_0(%arg0: i32) -> (i32, i32, i32) {
    %c0_i32 = arith.constant 0 : i32
    %c0_i32_0 = arith.constant 0 : i32
    %c0_i32_1 = arith.constant 0 : i32
    return %arg0, %c0_i32, %c0_i32_0 : i32, i32, i32
  }
  func.func @transform_1(%arg0: i32) -> (i32, i32) {
    %c0_i32 = arith.constant 0 : i32
    %c0_i32_0 = arith.constant 0 : i32
    %c0_i32_1 = arith.constant 0 : i32
    return %c0_i32, %c0_i32_0 : i32, i32
  }
  func.func @transform_2(%arg0: i32) -> (i32, i32) {
    %c0_i32 = arith.constant 0 : i32
    %c0_i32_0 = arith.constant 0 : i32
    %c0_i32_1 = arith.constant 0 : i32
    return %c0_i32, %c0_i32_0 : i32, i32
  }
  func.func @transform_3(%arg0: i32) -> (i32, i32, i32) {
    %c0_i32 = arith.constant 0 : i32
    %c0_i32_0 = arith.constant 0 : i32
    %c0_i32_1 = arith.constant 0 : i32
    return %arg0, %c0_i32, %c0_i32_0 : i32, i32, i32
  }
}

</mosaic_0001>

<bundles_post_ra>
// kernel: tpu_custom_call.1
= control target key start
LH: loop header
LB: loop body
LE: loop exit
PB: predicated region body
PF: predicated region fallthrough
CT: control target
= control target key end

     0   :  { %8 = vsyncpa [#allocation3], 0  ;;  %s468_s0 = inlined_call_operand.hbm [shape: f32[2,32,256], index: 0, kind: input, shape index: {}]   ;;  %s469_s1 = inlined_call_operand.vmem [shape: f32[32,2], index: 1, kind: input, shape index: {}]   ;;  %s470_s2 = inlined_call_operand.vmem [shape: f32[2,32], index: 2, kind: input, shape index: {}]   ;;  %s471_s3 = inlined_call_operand.hbm [shape: f32[2,32,256], index: 3, kind: output, shape index: {}]  }
   0x1   :  { %9 = vsyncpa [#allocation4], 0  ;;  %s14_s14 = sshll.u32 %s468_s0, 4  ;;  %s353_s15 = smov [#allocation2]   ;;  %s15_s14 = int_to_ptr.hbm [resolvable:$true] %s14_s14 }
   0x2   :  { %s16_s16 = sshll.u32 %s353_s15, 4  ;;  %s354_s17 = smov 256   ;;  %s17_s16 = int_to_ptr.vmem [resolvable:$true] %s16_s16 }
   0x3   :  { %s355_s18 = smov 16  }
   0x4   :  { %22 = dma.hbm_to_vmem [thread:$0]  %s15_s14, 2048, %s17_s16, [#allocation3], %s354_s17, %s354_s17, %s355_s18  }
   0x5   :  { %349 = dma.done.wait [#allocation3], 2048  }
   0x6   :  { %350 = vsyncadd [#allocation3], 4294965248  ;;  %v383_v0 = vld [vmem:[#allocation2 + $0x40] sm:$0xff]  ;;  %v385_v1 = vld [vmem:[#allocation2 + $0x48] sm:$0xff]  ;;  %v83_v29 = vlaneseq  ;;  %vm88_vm0 = vcmask 130112   ;;  %vm92_vm1 = vcmask 195712  }
   0x7   :  { %v387_v2 = vld [vmem:[#allocation2] sm:$0xff]  ;;  %v59_v3 = vadd.f32 %v385_v1, %v383_v0  ;;  %v391_v4 = vld [vmem:[#allocation2 + $0x8] sm:$0xff]  ;;  %v401_v9 = vld [vmem:[#allocation2 + $0x50] sm:$0xff]  ;;  %vm96_vm2 = vcmask 261312   ;;  %vm105_vm3 = vcmask 1041409   ;;  %vm107_vm4 = vcmask 261120  }
   0x8   :  { %v393_v5 = vld [vmem:[#allocation2 + $0x20] sm:$0xff]  ;;  %v395_v6 = vld [vmem:[#allocation2 + $0x28] sm:$0xff]  ;;  %v47_v7 = vadd.f32 %v391_v4, %v387_v2  ;;  %v403_v10 = vld [vmem:[#allocation2 + $0x58] sm:$0xff]  ;;  %v84_v32 = vand.u32 127, %v83_v29  ;;  %vm136_vm5 = vcmask 1041408   ;;  %vm132_vm6 = vcmask 15360  }
   0x9   :  { %v53_v8 = vadd.f32 %v395_v6, %v393_v5  ;;  %60 = vadd.xlane.f32.xlu1 %v59_v3  ;;  %v405_v11 = vld [vmem:[#allocation2 + $0x10] sm:$0xff]  ;;  %v407_v12 = vld [vmem:[#allocation2 + $0x18] sm:$0xff]  ;;  %v409_v13 = vld [vmem:[#allocation2 + $0x60] sm:$0xff]  ;;  %v62_v15 = vadd.f32 %v403_v10, %v401_v9  ;;  %v181_v59 = vshrl.u32 %v83_v29, 7  ;;  %s267_s30 = sshll.u32 %s471_s3, 4  ;;  %s268_s30 = int_to_ptr.hbm [resolvable:$true] %s267_s30 }
   0xa   :  { %48 = vadd.xlane.f32.xlu0 %v47_v7  ;;  %v411_v14 = vld [vmem:[#allocation2 + $0x68] sm:$0xff]  ;;  %v50_v16 = vadd.f32 %v407_v12, %v405_v11  ;;  %v419_v18 = vld [vmem:[#allocation2 + $0x70] sm:$0xff]  ;;  %v421_v19 = vld [vmem:[#allocation2 + $0x78] sm:$0xff]  ;;  %v86_v33 = vadd.s32 4294967288, %v84_v32  ;;  %v90_v38 = vadd.s32 4294967280, %v84_v32  ;;  %v94_v41 = vadd.s32 4294967272, %v84_v32 }
   0xb   :  { %54 = vadd.xlane.f32.xlu2 %v53_v8  ;;  %v65_v17 = vadd.f32 %v411_v14, %v409_v13  ;;  %v423_v20 = vld [vmem:[#allocation2 + $0x30] sm:$0xff]  ;;  %v425_v21 = vld [vmem:[#allocation2 + $0x38] sm:$0xff]  ;;  %v68_v22 = vadd.f32 %v421_v19, %v419_v18  ;;  %v72_v26 = vld [vmem:[%s469_s1 + $0x8] sm:$0xff]  ;;  %v194_v60 = vadd.s32 16, %v181_v59  ;;  %v188_v61 = vadd.s32 8, %v181_v59 }
   0xc   :  { %v56_v23 = vadd.f32 %v425_v21, %v423_v20  ;;  %v74_v24 = vld [vmem:[%s469_s1 + $0x18] sm:$0xff]  ;;  %v73_v25 = vld [vmem:[%s469_s1 + $0x10] sm:$0xff]  ;;  %v71_v27 = vld [vmem:[%s469_s1] sm:$0xff]  ;;  %288 = vset.pattern.permute.xlu2 %v181_v59  ;;  %v200_v29 = vadd.s32 24, %v181_v59 }
   0xd   :  { %122 = vmatpush.msra.mxu0 %v74_v24  ;;  %v131_v56 = vld [vmem:[%s470_s2] sm:$0x3]  ;;  %290 = vset.pattern.permute.xlu1 %v194_v60  ;;  %s356_s2 = smov [#allocation5]  }
   0xe   :  { %281 = vmatpush.msk.msra.mxu1 %vm136_vm5, %v131_v56  ;;  %289 = vset.pattern.permute.xlu0 %v188_v61  ;;  %s265_s27 = sshll.u32 %s356_s2, 4  ;;  %s266_s27 = int_to_ptr.vmem [resolvable:$true] %s265_s27 }
   0xf   :  { %123 = vmatpush.msra.mxu0 %v73_v25 }
  0x11   :  { %63 = vadd.xlane.f32.xlu1 %v62_v15  ;;  %124 = vmatpush.msra.mxu0 %v72_v26 }
  0x12   :  { %51 = vadd.xlane.f32.xlu0 %v50_v16 }
  0x13   :  { %66 = vadd.xlane.f32.xlu2 %v65_v17  ;;  %125 = vmatpush.msra.mxu0 %v71_v27 }
  0x19   :  { %69 = vadd.xlane.f32.xlu1 %v68_v22 }
  0x1a   :  { %57 = vadd.xlane.f32.xlu0 %v56_v23 }
  0x7c   :  { %v61_v28 = vpop.xlane.xlu1 %60 }
  0x7d   :  { %v49_v30 = vpop.xlane.xlu0 %48  ;;  %v98_v40 = vperm.slane %v61_v28, %v84_v32 }
  0x7e   :  { %v55_v31 = vpop.xlane.xlu2 %54  ;;  %v85_v42 = vperm.slane %v49_v30, %v84_v32 }
  0x7f   :  { %v91_v47 = vperm.slane %v55_v31, %v90_v38 }
  0x84   :  { %v64_v34 = vpop.xlane.xlu1 %63 }
  0x85   :  { %v52_v35 = vpop.xlane.xlu0 %51  ;;  %v99_v36 = vperm.slane %v64_v34, %v86_v33 }
  0x86   :  { %v67_v37 = vpop.xlane.xlu2 %66  ;;  %v87_v39 = vperm.slane %v52_v35, %v86_v33 }
  0x87   :  { %v101_v43 = vperm.slane %v67_v37, %v90_v38  ;;  %v100_v44 = vsel %vm88_vm0, %v99_v36, %v98_v40 }
  0x88   :  { %v89_v45 = vsel %vm88_vm0, %v87_v39, %v85_v42 }
  0x89   :  { %v102_v50 = vsel %vm92_vm1, %v101_v43, %v100_v44  ;;  %v93_v52 = vsel %vm92_vm1, %v91_v47, %v89_v45 }
  0x8c   :  { %v70_v46 = vpop.xlane.xlu1 %69 }
  0x8d   :  { %v103_v48 = vperm.slane %v70_v46, %v94_v41  ;;  %v58_v49 = vpop.xlane.xlu0 %57 }
  0x8e   :  { %v95_v51 = vperm.slane %v58_v49, %v94_v41 }
  0x8f   :  { %v104_v53 = vsel %vm96_vm2, %v103_v48, %v102_v50 }
  0x90   :  { %v97_v54 = vsel %vm96_vm2, %v95_v51, %v93_v52 }
  0x91   :  { %v106_v55 = vsel %vm105_vm3, %v104_v53, %v97_v54 }
  0x92   :  { %280 = vmatmul.msk.f32.vlgmr.msra.gmra.mxu0 %vm107_vm4, %v106_v55 }
 0x10f   :  { %v127_v57 = vpop.f32.mrf.mxu0 }
 0x110   :  { %v130_v58 = vmax.f32 %v127_v57, 0.0 }
 0x112   :  { %282 = vmatmul.msk.f32.vlgmr.msra.gmra.mxu1 %vm132_vm6, %v130_v58 }
 0x18f   :  { %v157_v62 = vpop.f32.mrf.mxu1 }
 0x190   :  { %v283_v63 = vmul.f32 -1.442695, %v157_v62 }
 0x192   :  { %297 = vpow2.f32 %v283_v63 }
 0x198   :  { %v298_v3 = vpop.eup %297 }
 0x199   :  { %v163_v7 = vadd.f32 1.0, %v298_v3 }
 0x19b   :  { %299 = vrcp.f32 %v163_v7  ;;  %v175_v17 = vand.u32 2147483648, %v163_v7  ;;  %v173_v23 = vand.u32 2147483647, %v163_v7  ;;  %vm169_vm8 = vweird.f32 %v163_v7 }
 0x19d   :  { %v176_v25 = vor.u32 1.1754944e-38, %v175_v17  ;;  %vm174_vm10 = vcmp.eq.f32.partialorder %v173_v23, 8.507059e+37 }
 0x1a1   :  { %v300_v8 = vpop.eup %299 }
 0x1a2   :  { %v165_v15 = vmul.f32 %v300_v8, %v163_v7  ;;  %vm170_vm7 = vweird.f32 %v300_v8 }
 0x1a3   :  { %vm171_vm9 = vmor %vm169_vm8, %vm170_vm7 }
 0x1a4   :  { %v166_v16 = vsub.f32 1.0, %v165_v15 }
 0x1a6   :  { %v167_v22 = vmul.f32 %v300_v8, %v166_v16 }
 0x1a8   :  { %v168_v24 = vadd.f32 %v300_v8, %v167_v22 }
 0x1aa   :  { %v172_v26 = vsel %vm171_vm9, %v300_v8, %v168_v24 }
 0x1ab   :  { %v177_v27 = vsel %vm174_vm10, %v176_v25, %v172_v26 }
 0x1ac   :  { %v179_v28 = vperm.slane %v177_v27, 0  ;;  %v204_v30 = vperm.slane %v177_v27, 1 }
 0x1ae   :  { %196 = vperm.xlu1 %290, %v179_v28   ;;  %190 = vperm.xlu0 %289, %v179_v28  }
 0x1af   :  { %184 = vperm.xlu2 %288, %v179_v28  }
 0x1b6   :  { %293 = vset.pattern.permute.xlu1 %v188_v61  ;;  %296 = vset.pattern.permute.xlu0 %v200_v29 }
 0x1b7   :  { %291 = vset.pattern.permute.xlu2 %v200_v29 }
 0x1be   :  { %215 = vperm.xlu1 %293, %v204_v30  }
 0x1bf   :  { %202 = vperm.xlu2 %291, %v179_v28  }
 0x1c6   :  { %295 = vset.pattern.permute.xlu1 %v200_v29 }
 0x1c7   :  { %292 = vset.pattern.permute.xlu2 %v181_v59 }
 0x1ce   :  { %227 = vperm.xlu1 %295, %v204_v30  }
 0x1cf   :  { %209 = vperm.xlu2 %292, %v204_v30  }
 0x1d7   :  { %294 = vset.pattern.permute.xlu2 %v194_v60 }
 0x1df   :  { %221 = vperm.xlu2 %294, %v204_v30  }
 0x209   :  { %v185_v31 = vpop.permute.xlu2 %184 }
 0x20a   :  { %v229_v32 = vmul.f32 %v185_v31, %v387_v2  ;;  %v230_v33 = vmul.f32 %v185_v31, %v391_v4 }
 0x20c   :  { %245 = vst [vmem:[#allocation5] sm:$0xff] %v229_v32 }
 0x20d   :  { %246 = vst [vmem:[#allocation5 + $0x8] sm:$0xff] %v230_v33 }
 0x219   :  { %v203_v34 = vpop.permute.xlu2 %202 }
 0x21a   :  { %v235_v35 = vmul.f32 %v203_v34, %v423_v20  ;;  %v236_v36 = vmul.f32 %v203_v34, %v425_v21 }
 0x21c   :  { %251 = vst [vmem:[#allocation5 + $0x30] sm:$0xff] %v235_v35 }
 0x21d   :  { %252 = vst [vmem:[#allocation5 + $0x38] sm:$0xff] %v236_v36 }
 0x220   :  { %v197_v37 = vpop.permute.xlu1 %196  ;;  %v191_v38 = vpop.permute.xlu0 %190 }
 0x221   :  { %v233_v39 = vmul.f32 %v197_v37, %v393_v5  ;;  %v234_v40 = vmul.f32 %v197_v37, %v395_v6  ;;  %v231_v41 = vmul.f32 %v191_v38, %v405_v11  ;;  %v232_v2 = vmul.f32 %v191_v38, %v407_v12 }
 0x223   :  { %249 = vst [vmem:[#allocation5 + $0x20] sm:$0xff] %v233_v39 }
 0x224   :  { %250 = vst [vmem:[#allocation5 + $0x28] sm:$0xff] %v234_v40 }
 0x225   :  { %247 = vst [vmem:[#allocation5 + $0x10] sm:$0xff] %v231_v41 }
 0x226   :  { %248 = vst [vmem:[#allocation5 + $0x18] sm:$0xff] %v232_v2 }
 0x229   :  { %v210_v4 = vpop.permute.xlu2 %209 }
 0x22a   :  { %v237_v20 = vmul.f32 %v210_v4, %v383_v0  ;;  %v238_v21 = vmul.f32 %v210_v4, %v385_v1 }
 0x22c   :  { %253 = vst [vmem:[#allocation5 + $0x40] sm:$0xff] %v237_v20 }
 0x22d   :  { %254 = vst [vmem:[#allocation5 + $0x48] sm:$0xff] %v238_v21 }
 0x230   :  { %v216_v42 = vpop.permute.xlu1 %215 }
 0x231   :  { %v239_v5 = vmul.f32 %v216_v42, %v401_v9  ;;  %v240_v6 = vmul.f32 %v216_v42, %v403_v10 }
 0x233   :  { %255 = vst [vmem:[#allocation5 + $0x50] sm:$0xff] %v239_v5 }
 0x234   :  { %256 = vst [vmem:[#allocation5 + $0x58] sm:$0xff] %v240_v6 }
 0x239   :  { %v222_v11 = vpop.permute.xlu2 %221 }
 0x23a   :  { %v241_v12 = vmul.f32 %v222_v11, %v409_v13  ;;  %v242_v43 = vmul.f32 %v222_v11, %v411_v14 }
 0x23c   :  { %257 = vst [vmem:[#allocation5 + $0x60] sm:$0xff] %v241_v12 }
 0x23d   :  { %258 = vst [vmem:[#allocation5 + $0x68] sm:$0xff] %v242_v43 }
 0x240   :  { %v228_v0 = vpop.permute.xlu1 %227 }
 0x241   :  { %v243_v1 = vmul.f32 %v228_v0, %v419_v18  ;;  %v244_v9 = vmul.f32 %v228_v0, %v421_v19 }
 0x243   :  { %259 = vst [vmem:[#allocation5 + $0x70] sm:$0xff] %v243_v1 }
 0x244   :  { %260 = vst [vmem:[#allocation5 + $0x78] sm:$0xff] %v244_v9 }
 0x245   :  { %273 = dma.vmem_to_hbm [thread:$0]  %s266_s27, 2048, %s268_s30, [#allocation4], %s354_s17, %s354_s17, %s355_s18  }
 0x246   :  { %351 = dma.done.wait [#allocation4], 2048  }
 0x247   :  { %352 = vsyncadd [#allocation4], 4294965248 }
 0x248   :  { %278 = vsyncpa [#allocation3], 1 }
 0x249   :  { %279 = vsyncpa [#allocation4], 1 }

</bundles_post_ra>
